<compile_context>
chip_gen: v5e
topology: v5e:2x2
jax: 0.10.0
libtpu: 0.0.40
codegen_flags: <defaults>
</compile_context>

<pallas_src>
import functools

import jax
import jax.numpy as jnp
from jax import lax
from jax.experimental import pallas as pl
from jax.experimental.pallas import tpu as pltpu


_NEG_BIG = -1e30  # finite stand-in for -inf (avoids inf - inf NaN hazards)


def _round_up(x: int, m: int) -> int:
    return ((x + m - 1) // m) * m


def _online_update(raw, mask_f, col_valid, out_ref, m_scr, l_scr, spos_scr,
                   npos_scr, *, scale):
    """Online (flash-style) LSE + masked-sum accumulation for one [TM, TN] tile.

    raw       : [TM, TN] f32  logits for this tile (already scaled by 1/T)
    mask_f    : [TM, TN] f32  positive-pair mask for this tile (0 at padded cols)
    col_valid : [1,  TN] bool which columns of this tile are real (not padding)
    """
    k = pl.program_id(1)

    @pl.when(k == 0)
    def _init():
        m_scr[...] = jnp.full_like(m_scr, _NEG_BIG)
        l_scr[...] = jnp.zeros_like(l_scr)
        spos_scr[...] = jnp.zeros_like(spos_scr)
        npos_scr[...] = jnp.zeros_like(npos_scr)

    logits = jnp.where(col_valid, raw, _NEG_BIG)            # kill padded columns
    m_prev = m_scr[...]
    m_new = jnp.maximum(m_prev, jnp.max(logits, axis=1, keepdims=True))
    alpha = jnp.exp(m_prev - m_new)
    l_scr[...] = alpha * l_scr[...] + jnp.sum(jnp.exp(logits - m_new),
                                              axis=1, keepdims=True)
    m_scr[...] = m_new
    # log_prob = raw - LSE(raw) is invariant to the max shift, so the positive-pair sum can be
    # accumulated on the raw logits and n_pos * LSE subtracted once at the end.
    spos_scr[...] += jnp.sum(mask_f * raw, axis=1, keepdims=True)
    npos_scr[...] += jnp.sum(mask_f, axis=1, keepdims=True)

    @pl.when(k == pl.num_programs(1) - 1)
    def _finalize():
        lse = m_scr[...] + jnp.log(l_scr[...])
        npos = npos_scr[...]
        mean_log_prob_pos = spos_scr[...] / jnp.maximum(npos, 1.0) - lse
        loss_rows = -scale * mean_log_prob_pos
        # Rows with zero positives would be 0/0 = NaN in the reference; guard them to 0.
        out_ref[...] = jnp.where(npos > 0.0, loss_rows, 0.0).astype(out_ref.dtype)


def _supcon_labels_kernel(a_ref, la_ref, b_ref, lb_ref, out_ref,
                          m_scr, l_scr, spos_scr, npos_scr,
                          *, inv_temp, scale, n_valid, tile_n):
    # Fold 1/T into the [TM, D] anchor tile (cheaper than scaling [TM, TN] logits); keep the
    # native dtype so bf16 runs the MXU at full rate; accumulate in f32; contract last dims
    # of both operands so no transposed copy of B is materialized.
    a = a_ref[...] * jnp.asarray(inv_temp, dtype=a_ref.dtype)
    raw = lax.dot_general(a, b_ref[...], (((1,), (1,)), ((), ())),
                          preferred_element_type=jnp.float32)        # [TM, TN] f32

    k = pl.program_id(1)
    col = k * tile_n + lax.broadcasted_iota(jnp.int32, (1, tile_n), 1)
    col_valid = col < n_valid                                         # [1, TN]

    # Build the positive-pair mask in-kernel from labels — no [M, N] mask in HBM.
    pos = la_ref[...] == lb_ref[...]                                  # [TM,1]==[1,TN] -> [TM,TN]
    mask_f = jnp.logical_and(pos, col_valid).astype(jnp.float32)

    _online_update(raw, mask_f, col_valid, out_ref,
                   m_scr, l_scr, spos_scr, npos_scr, scale=scale)


def _supcon_mask_kernel(a_ref, b_ref, mask_ref, out_ref,
                        m_scr, l_scr, spos_scr, npos_scr,
                        *, inv_temp, scale, n_valid, tile_n):
    a = a_ref[...] * jnp.asarray(inv_temp, dtype=a_ref.dtype)
    raw = lax.dot_general(a, b_ref[...], (((1,), (1,)), ((), ())),
                          preferred_element_type=jnp.float32)

    k = pl.program_id(1)
    col = k * tile_n + lax.broadcasted_iota(jnp.int32, (1, tile_n), 1)
    col_valid = col < n_valid

    mask_f = mask_ref[...].astype(jnp.float32)   # padded region was zero-padded

    _online_update(raw, mask_f, col_valid, out_ref,
                   m_scr, l_scr, spos_scr, npos_scr, scale=scale)


def cross_supcon_loss(features_A, features_B, labels_A=None, labels_B=None,
                      mask=None, temperature=0.07, contrast_mode='all',
                      base_temperature=0.07, block_m=256, block_n=256):
    """JAX/Pallas equivalent of CrossSupConLoss.forward (forward pass only)."""
    if features_A.ndim < 3 or features_B.ndim < 3:
        raise ValueError('`features` needs to be [bsz, n_views, ...]')
    if features_A.ndim > 3:
        features_A = features_A.reshape(features_A.shape[0], features_A.shape[1], -1)
    if features_B.ndim > 3:
        features_B = features_B.reshape(features_B.shape[0], features_B.shape[1], -1)

    bsz = features_A.shape[0]
    contrast_count = features_A.shape[1]

    if (labels_A is None) != (labels_B is None):
        raise ValueError('both labels_A and labels_B should be None or not')
    have_labels = labels_A is not None
    if have_labels and mask is not None:
        raise ValueError('Cannot define both `labels` and `mask`')

    # torch.cat(torch.unbind(f, dim=1), dim=0)  ==  transpose(0, 1) then flatten.
    cA = jnp.transpose(features_A, (1, 0, 2)).reshape(-1, features_A.shape[-1])
    cB = jnp.transpose(features_B, (1, 0, 2)).reshape(-1, features_B.shape[-1])

    if contrast_mode == 'one':
        anchor = features_A[:, 0]
        anchor_count = 1
    elif contrast_mode == 'all':
        anchor = cA
        anchor_count = contrast_count
    else:
        raise ValueError('Unknown mode: {}'.format(contrast_mode))

    M, D = anchor.shape
    N = cB.shape[0]

    # Tile sizes: TM 8-aligned (or full), TN 128-aligned (or full). Pad M/N to tile multiples;
    # padded contrast columns are masked in-kernel, padded anchor rows are sliced off below.
    tm = min(block_m, _round_up(M, 8))
    tn = min(block_n, _round_up(N, 128))
    m_pad = _round_up(M, tm)
    n_pad = _round_up(N, tn)

    anchor_p = jnp.pad(anchor, ((0, m_pad - M), (0, 0)))
    cB_p = jnp.pad(cB, ((0, n_pad - N), (0, 0)))

    grid = (m_pad // tm, n_pad // tn)
    out_shape = jax.ShapeDtypeStruct((m_pad, 1), jnp.float32)
    out_spec = pl.BlockSpec((tm, 1), lambda i, k: (i, 0))
    scratch = [pltpu.VMEM((tm, 1), jnp.float32)] * 4       # m_i, l_i, S_pos, n_pos
    compiler_params = pltpu.CompilerParams(
        dimension_semantics=("parallel", "arbitrary"))     # rows parallel (v7x megacore), N-reduction last

    inv_temp = float(1.0 / temperature)
    scale = float(temperature / base_temperature)

    if have_labels or mask is None:
        # Labels path, or SimCLR default (eye mask == label equality with labels = arange(bsz)).
        if have_labels:
            la = jnp.asarray(labels_A).reshape(-1).astype(jnp.int32)
            lb = jnp.asarray(labels_B).reshape(-1).astype(jnp.int32)
            if la.shape[0] != bsz or lb.shape[0] != bsz:
                raise ValueError('Num of labels does not match num of features')
        else:
            la = jnp.arange(bsz, dtype=jnp.int32)
            lb = jnp.arange(bsz, dtype=jnp.int32)
        anchor_labels = jnp.tile(la, anchor_count)                  # [M]
        contrast_labels = jnp.tile(lb, contrast_count)              # [N]
        la_p = jnp.pad(anchor_labels, (0, m_pad - M),
                       constant_values=-1).reshape(m_pad, 1)
        lb_p = jnp.pad(contrast_labels, (0, n_pad - N),
                       constant_values=-2).reshape(1, n_pad)

        kernel = functools.partial(_supcon_labels_kernel, inv_temp=inv_temp,
                                   scale=scale, n_valid=N, tile_n=tn)
        loss_rows = pl.pallas_call(
            kernel,
            out_shape=out_shape,
            grid_spec=pltpu.PrefetchScalarGridSpec(
                num_scalar_prefetch=0,
                grid=grid,
                in_specs=[
                    pl.BlockSpec((tm, D), lambda i, k: (i, 0)),     # anchor rows
                    pl.BlockSpec((tm, 1), lambda i, k: (i, 0)),     # anchor labels
                    pl.BlockSpec((tn, D), lambda i, k: (k, 0)),     # contrast rows
                    pl.BlockSpec((1, tn), lambda i, k: (0, k)),     # contrast labels
                ],
                out_specs=out_spec,
                scratch_shapes=scratch),
            compiler_params=compiler_params,
        )(anchor_p, la_p, cB_p, lb_p)
    else:
        # Arbitrary user-supplied [bsz, bsz] mask: cannot be expressed as label equality, so the
        # tiled mask is materialized — but in bf16 (exact for 0/1) and streamed per tile.
        mask_big = jnp.tile(jnp.asarray(mask).astype(jnp.bfloat16),
                            (anchor_count, contrast_count))
        mask_big = jnp.pad(mask_big, ((0, m_pad - M), (0, n_pad - N)))
        kernel = functools.partial(_supcon_mask_kernel, inv_temp=inv_temp,
                                   scale=scale, n_valid=N, tile_n=tn)
        loss_rows = pl.pallas_call(
            kernel,
            out_shape=out_shape,
            grid_spec=pltpu.PrefetchScalarGridSpec(
                num_scalar_prefetch=0,
                grid=grid,
                in_specs=[
                    pl.BlockSpec((tm, D), lambda i, k: (i, 0)),
                    pl.BlockSpec((tn, D), lambda i, k: (k, 0)),
                    pl.BlockSpec((tm, tn), lambda i, k: (i, k)),
                ],
                out_specs=out_spec,
                scratch_shapes=scratch),
            compiler_params=compiler_params,
        )(anchor_p, cB_p, mask_big)

    # Final mean over the M real anchor rows (tiny reduction; done in plain JAX so the
    # row-tile grid axis stays megacore-parallel inside the kernel).
    return jnp.mean(loss_rows[:M, 0])


def _reference_loss(features_A, features_B, labels_A=None, labels_B=None, mask=None,
                    temperature=0.07, base_temperature=0.07, contrast_mode='all'):
    """Pure-JAX reference mirroring the PyTorch forward."""
    bsz, n_views, d = features_A.shape
    if labels_A is not None:
        mask = (labels_A.reshape(-1, 1) == labels_B.reshape(1, -1)).astype(jnp.float32)
    elif mask is None:
        mask = jnp.eye(bsz, dtype=jnp.float32)
    else:
        mask = mask.astype(jnp.float32)
    cA = jnp.transpose(features_A, (1, 0, 2)).reshape(-1, d).astype(jnp.float32)
    cB = jnp.transpose(features_B, (1, 0, 2)).reshape(-1, d).astype(jnp.float32)
    if contrast_mode == 'one':
        anchor = features_A[:, 0].astype(jnp.float32)
        anchor_count = 1
    else:
        anchor = cA
        anchor_count = n_views
    logits = (anchor @ cB.T) / temperature
    logits = logits - jnp.max(logits, axis=1, keepdims=True)
    log_prob = logits - jnp.log(jnp.sum(jnp.exp(logits), axis=1, keepdims=True))
    mask_big = jnp.tile(mask, (anchor_count, n_views))
    mlpp = jnp.sum(mask_big * log_prob, axis=1) / jnp.sum(mask_big, axis=1)
    loss = -(temperature / base_temperature) * mlpp
    return jnp.mean(loss)


if __name__ == "__main__":
    key = jax.random.PRNGKey(0)

    # --- Test 1: small labels path (single N tile; exercises column padding 16 -> 128) ---
    bsz, n_views, dim = 8, 2, 32
    kA, kB = jax.random.split(key)
    fA = jax.random.normal(kA, (bsz, n_views, dim), dtype=jnp.float32)
    fB = jax.random.normal(kB, (bsz, n_views, dim), dtype=jnp.float32)
    fA = fA / jnp.linalg.norm(fA, axis=-1, keepdims=True)
    fB = fB / jnp.linalg.norm(fB, axis=-1, keepdims=True)
    labels_A = jnp.array([0, 1, 2, 0, 1, 2, 0, 1], dtype=jnp.int32)
    labels_B = jnp.roll(labels_A, 3)   # every class in A appears in B -> no zero-positive rows

    loss = jax.block_until_ready(
        cross_supcon_loss(fA, fB, labels_A=labels_A, labels_B=labels_B))
    ref = _reference_loss(fA, fB, labels_A, labels_B)
    assert jnp.allclose(loss, ref, rtol=1e-4, atol=1e-4), (loss, ref)

    # --- Test 2: SimCLR default (no labels, no mask -> identity mask via in-kernel labels) ---
    loss_eye = jax.block_until_ready(cross_supcon_loss(fA, fB))
    ref_eye = _reference_loss(fA, fB)
    assert jnp.allclose(loss_eye, ref_eye, rtol=1e-4, atol=1e-4), (loss_eye, ref_eye)

    # --- Test 3: explicit mask path (tiled bf16 mask kernel) ---
    mask = (labels_A[:, None] == labels_B[None, :]).astype(jnp.float32)
    loss_mask = jax.block_until_ready(cross_supcon_loss(fA, fB, mask=mask))
    assert jnp.allclose(loss_mask, ref, rtol=1e-4, atol=1e-4), (loss_mask, ref)

    # --- Test 4: multi-tile grid (online LSE across N tiles, row + column padding) ---
    bsz2, nv2, dim2 = 100, 2, 64
    k1, k2 = jax.random.split(jax.random.PRNGKey(1))
    gA = jax.random.normal(k1, (bsz2, nv2, dim2), dtype=jnp.float32)
    gB = jax.random.normal(k2, (bsz2, nv2, dim2), dtype=jnp.float32)
    gA = gA / jnp.linalg.norm(gA, axis=-1, keepdims=True)
    gB = gB / jnp.linalg.norm(gB, axis=-1, keepdims=True)
    lab2A = jnp.arange(bsz2, dtype=jnp.int32) % 6
    lab2B = jnp.roll(lab2A, 7)
    loss2 = jax.block_until_ready(
        cross_supcon_loss(gA, gB, labels_A=lab2A, labels_B=lab2B,
                          block_m=64, block_n=128))
    ref2 = _reference_loss(gA, gB, lab2A, lab2B)
    assert jnp.allclose(loss2, ref2, rtol=1e-4, atol=1e-4), (loss2, ref2)

    # --- Test 5: bf16 features straight into the MXU (f32 accumulation) ---
    loss_bf16 = jax.block_until_ready(
        cross_supcon_loss(fA.astype(jnp.bfloat16), fB.astype(jnp.bfloat16),
                          labels_A=labels_A, labels_B=labels_B))
    assert bool(jnp.isfinite(loss_bf16))
    assert jnp.allclose(loss_bf16, ref, rtol=1e-1, atol=1e-1), (loss_bf16, ref)

    print("KERNEL_OK")
</pallas_src>

<mosaic_0001>
module attributes {stable_mosaic.version = 11 : i64} {
  func.func @_supcon_labels_kernel(%arg0: i32, %arg1: i32, %arg2: memref<16x32xf32, #tpu.memory_space<vmem>>, %arg3: memref<16x1xi32, #tpu.memory_space<vmem>>, %arg4: memref<128x32xf32, #tpu.memory_space<vmem>>, %arg5: memref<1x128xi32, #tpu.memory_space<vmem>>, %arg6: memref<16x1xf32, #tpu.memory_space<vmem>>, %arg7: memref<16x1xf32, #tpu.memory_space<vmem>>, %arg8: memref<16x1xf32, #tpu.memory_space<vmem>>, %arg9: memref<16x1xf32, #tpu.memory_space<vmem>>, %arg10: memref<16x1xf32, #tpu.memory_space<vmem>>) attributes {dimension_semantics = [#tpu.dimension_semantics<parallel>, #tpu.dimension_semantics<arbitrary>], iteration_bounds = array<i64: 1, 1>, scalar_prefetch = 0 : i64, scratch_operands = 4 : i64, tpu.core_type = #tpu.core_type<tc>, window_params = [{transform_indices = @transform_0, window_bounds = array<i64: 16, 32>}, {transform_indices = @transform_1, window_bounds = array<i64: 16, 1>}, {transform_indices = @transform_2, window_bounds = array<i64: 128, 32>}, {transform_indices = @transform_3, window_bounds = array<i64: 1, 128>}, {transform_indices = @transform_4, window_bounds = array<i64: 16, 1>}]} {
    %c0 = arith.constant 0 : index
    %c0_0 = arith.constant 0 : index
    %0 = vector.load %arg2[%c0, %c0_0] : memref<16x32xf32, #tpu.memory_space<vmem>>, vector<16x32xf32>
    %cst = arith.constant 14.2857141 : f32
    %1 = vector.broadcast %cst : f32 to vector<16x32xf32>
    %2 = arith.mulf %0, %1 : vector<16x32xf32>
    %c0_1 = arith.constant 0 : index
    %c0_2 = arith.constant 0 : index
    %3 = vector.load %arg4[%c0_1, %c0_2] : memref<128x32xf32, #tpu.memory_space<vmem>>, vector<128x32xf32>
    %cst_3 = arith.constant dense<0.000000e+00> : vector<16x128xf32>
    %4 = tpu.matmul %2, %3, %cst_3 {dimension_numbers = #tpu.dot_dimension_numbers<[1], [1], [0], [0], [0, 0, 1, 0], [], []>} : vector<16x32xf32>, vector<128x32xf32>, vector<16x128xf32> -> vector<16x128xf32>
    %c128_i32 = arith.constant 128 : i32
    %5 = arith.muli %arg1, %c128_i32 : i32
    %6 = tpu.iota {dimensions = array<i32: 1>} : vector<1x128xi32>
    %7 = vector.broadcast %5 : i32 to vector<1x128xi32>
    %8 = arith.addi %7, %6 : vector<1x128xi32>
    %c16_i32 = arith.constant 16 : i32
    %9 = vector.broadcast %c16_i32 : i32 to vector<1x128xi32>
    %10 = arith.cmpi slt, %8, %9 : vector<1x128xi32>
    %c0_4 = arith.constant 0 : index
    %c0_5 = arith.constant 0 : index
    %11 = vector.load %arg3[%c0_4, %c0_5] : memref<16x1xi32, #tpu.memory_space<vmem>>, vector<16x1xi32>
    %c0_6 = arith.constant 0 : index
    %c0_7 = arith.constant 0 : index
    %12 = vector.load %arg5[%c0_6, %c0_7] : memref<1x128xi32, #tpu.memory_space<vmem>>, vector<1x128xi32>
    %13 = vector.broadcast %11 : vector<16x1xi32> to vector<16x128xi32>
    %14 = vector.broadcast %12 : vector<1x128xi32> to vector<16x128xi32>
    %15 = arith.cmpi eq, %13, %14 : vector<16x128xi32>
    %16 = vector.broadcast %10 : vector<1x128xi1> to vector<16x128xi1>
    %17 = arith.andi %15, %16 : vector<16x128xi1>
    %18 = arith.extui %17 : vector<16x128xi1> to vector<16x128xi32>
    %19 = arith.sitofp %18 : vector<16x128xi32> to vector<16x128xf32>
    %c0_i32 = arith.constant 0 : i32
    %20 = arith.cmpi eq, %arg1, %c0_i32 : i32
    %21 = arith.extui %20 : i1 to i32
    %c0_i32_8 = arith.constant 0 : i32
    %22 = arith.cmpi ne, %21, %c0_i32_8 : i32
    scf.if %22 {
      %cst_32 = arith.constant -1.000000e+30 : f32
      %57 = vector.broadcast %cst_32 : f32 to vector<16x1xf32>
      %c0_33 = arith.constant 0 : index
      %c0_34 = arith.constant 0 : index
      %58 = vector.load %arg7[%c0_33, %c0_34] : memref<16x1xf32, #tpu.memory_space<vmem>>, vector<16x1xf32>
      tpu.vector_store %arg7[%c0_33, %c0_34], %57 {strides = array<i32>} : memref<16x1xf32, #tpu.memory_space<vmem>>, vector<16x1xf32>,
      %cst_35 = arith.constant 0.000000e+00 : f32
      %59 = vector.broadcast %cst_35 : f32 to vector<16x1xf32>
      %c0_36 = arith.constant 0 : index
      %c0_37 = arith.constant 0 : index
      %60 = vector.load %arg8[%c0_36, %c0_37] : memref<16x1xf32, #tpu.memory_space<vmem>>, vector<16x1xf32>
      tpu.vector_store %arg8[%c0_36, %c0_37], %59 {strides = array<i32>} : memref<16x1xf32, #tpu.memory_space<vmem>>, vector<16x1xf32>,
      %cst_38 = arith.constant 0.000000e+00 : f32
      %61 = vector.broadcast %cst_38 : f32 to vector<16x1xf32>
      %c0_39 = arith.constant 0 : index
      %c0_40 = arith.constant 0 : index
      %62 = vector.load %arg9[%c0_39, %c0_40] : memref<16x1xf32, #tpu.memory_space<vmem>>, vector<16x1xf32>
      tpu.vector_store %arg9[%c0_39, %c0_40], %61 {strides = array<i32>} : memref<16x1xf32, #tpu.memory_space<vmem>>, vector<16x1xf32>,
      %cst_41 = arith.constant 0.000000e+00 : f32
      %63 = vector.broadcast %cst_41 : f32 to vector<16x1xf32>
      %c0_42 = arith.constant 0 : index
      %c0_43 = arith.constant 0 : index
      %64 = vector.load %arg10[%c0_42, %c0_43] : memref<16x1xf32, #tpu.memory_space<vmem>>, vector<16x1xf32>
      tpu.vector_store %arg10[%c0_42, %c0_43], %63 {strides = array<i32>} : memref<16x1xf32, #tpu.memory_space<vmem>>, vector<16x1xf32>,
    } else {
    }
    %cst_9 = arith.constant -1.000000e+30 : f32
    %23 = vector.shape_cast %10 : vector<1x128xi1> to vector<1x128xi1>
    %24 = vector.broadcast %23 : vector<1x128xi1> to vector<16x128xi1>
    %25 = vector.broadcast %cst_9 : f32 to vector<16x128xf32>
    %26 = arith.select %24, %4, %25 : vector<16x128xi1>, vector<16x128xf32>
    %c0_10 = arith.constant 0 : index
    %c0_11 = arith.constant 0 : index
    %27 = vector.load %arg7[%c0_10, %c0_11] : memref<16x1xf32, #tpu.memory_space<vmem>>, vector<16x1xf32>
    %cst_12 = arith.constant dense<0xFF800000> : vector<16xf32>
    %28 = vector.multi_reduction <maximumf>, %26, %cst_12 [1] : vector<16x128xf32> to vector<16xf32>
    %29 = vector.shape_cast %28 : vector<16xf32> to vector<16x1xf32>
    %30 = arith.maximumf %27, %29 : vector<16x1xf32>
    %31 = arith.subf %27, %30 : vector<16x1xf32>
    %32 = math.exp %31 : vector<16x1xf32>
    %c0_13 = arith.constant 0 : index
    %c0_14 = arith.constant 0 : index
    %33 = vector.load %arg8[%c0_13, %c0_14] : memref<16x1xf32, #tpu.memory_space<vmem>>, vector<16x1xf32>
    %34 = arith.mulf %32, %33 : vector<16x1xf32>
    %35 = vector.broadcast %30 : vector<16x1xf32> to vector<16x128xf32>
    %36 = arith.subf %26, %35 : vector<16x128xf32>
    %37 = math.exp %36 : vector<16x128xf32>
    %cst_15 = arith.constant dense<0.000000e+00> : vector<16xf32>
    %38 = vector.multi_reduction <add>, %37, %cst_15 [1] : vector<16x128xf32> to vector<16xf32>
    %39 = vector.shape_cast %38 : vector<16xf32> to vector<16x1xf32>
    %40 = arith.addf %34, %39 : vector<16x1xf32>
    %c0_16 = arith.constant 0 : index
    %c0_17 = arith.constant 0 : index
    %41 = vector.load %arg8[%c0_16, %c0_17] : memref<16x1xf32, #tpu.memory_space<vmem>>, vector<16x1xf32>
    tpu.vector_store %arg8[%c0_16, %c0_17], %40 {strides = array<i32>} : memref<16x1xf32, #tpu.memory_space<vmem>>, vector<16x1xf32>,
    %c0_18 = arith.constant 0 : index
    %c0_19 = arith.constant 0 : index
    %42 = vector.load %arg7[%c0_18, %c0_19] : memref<16x1xf32, #tpu.memory_space<vmem>>, vector<16x1xf32>
    tpu.vector_store %arg7[%c0_18, %c0_19], %30 {strides = array<i32>} : memref<16x1xf32, #tpu.memory_space<vmem>>, vector<16x1xf32>,
    %c0_20 = arith.constant 0 : index
    %c0_21 = arith.constant 0 : index
    %43 = vector.load %arg9[%c0_20, %c0_21] : memref<16x1xf32, #tpu.memory_space<vmem>>, vector<16x1xf32>
    %44 = arith.mulf %19, %4 : vector<16x128xf32>
    %cst_22 = arith.constant dense<0.000000e+00> : vector<16xf32>
    %45 = vector.multi_reduction <add>, %44, %cst_22 [1] : vector<16x128xf32> to vector<16xf32>
    %46 = vector.shape_cast %45 : vector<16xf32> to vector<16x1xf32>
    %47 = arith.addf %43, %46 : vector<16x1xf32>
    %c0_23 = arith.constant 0 : index
    %c0_24 = arith.constant 0 : index
    %48 = vector.load %arg9[%c0_23, %c0_24] : memref<16x1xf32, #tpu.memory_space<vmem>>, vector<16x1xf32>
    tpu.vector_store %arg9[%c0_23, %c0_24], %47 {strides = array<i32>} : memref<16x1xf32, #tpu.memory_space<vmem>>, vector<16x1xf32>,
    %c0_25 = arith.constant 0 : index
    %c0_26 = arith.constant 0 : index
    %49 = vector.load %arg10[%c0_25, %c0_26] : memref<16x1xf32, #tpu.memory_space<vmem>>, vector<16x1xf32>
    %cst_27 = arith.constant dense<0.000000e+00> : vector<16xf32>
    %50 = vector.multi_reduction <add>, %19, %cst_27 [1] : vector<16x128xf32> to vector<16xf32>
    %51 = vector.shape_cast %50 : vector<16xf32> to vector<16x1xf32>
    %52 = arith.addf %49, %51 : vector<16x1xf32>
    %c0_28 = arith.constant 0 : index
    %c0_29 = arith.constant 0 : index
    %53 = vector.load %arg10[%c0_28, %c0_29] : memref<16x1xf32, #tpu.memory_space<vmem>>, vector<16x1xf32>
    tpu.vector_store %arg10[%c0_28, %c0_29], %52 {strides = array<i32>} : memref<16x1xf32, #tpu.memory_space<vmem>>, vector<16x1xf32>,
    %c0_i32_30 = arith.constant 0 : i32
    %54 = arith.cmpi eq, %arg1, %c0_i32_30 : i32
    %55 = arith.extui %54 : i1 to i32
    %c0_i32_31 = arith.constant 0 : i32
    %56 = arith.cmpi ne, %55, %c0_i32_31 : i32
    scf.if %56 {
      %c0_32 = arith.constant 0 : index
      %c0_33 = arith.constant 0 : index
      %57 = vector.load %arg7[%c0_32, %c0_33] : memref<16x1xf32, #tpu.memory_space<vmem>>, vector<16x1xf32>
      %c0_34 = arith.constant 0 : index
      %c0_35 = arith.constant 0 : index
      %58 = vector.load %arg8[%c0_34, %c0_35] : memref<16x1xf32, #tpu.memory_space<vmem>>, vector<16x1xf32>
      %59 = math.log %58 : vector<16x1xf32>
      %60 = arith.addf %57, %59 : vector<16x1xf32>
      %c0_36 = arith.constant 0 : index
      %c0_37 = arith.constant 0 : index
      %61 = vector.load %arg10[%c0_36, %c0_37] : memref<16x1xf32, #tpu.memory_space<vmem>>, vector<16x1xf32>
      %c0_38 = arith.constant 0 : index
      %c0_39 = arith.constant 0 : index
      %62 = vector.load %arg9[%c0_38, %c0_39] : memref<16x1xf32, #tpu.memory_space<vmem>>, vector<16x1xf32>
      %cst_40 = arith.constant 1.000000e+00 : f32
      %63 = vector.broadcast %cst_40 : f32 to vector<16x1xf32>
      %64 = arith.maximumf %61, %63 : vector<16x1xf32>
      %65 = arith.divf %62, %64 : vector<16x1xf32>
      %66 = arith.subf %65, %60 : vector<16x1xf32>
      %cst_41 = arith.constant -1.000000e+00 : f32
      %67 = vector.broadcast %cst_41 : f32 to vector<16x1xf32>
      %68 = arith.mulf %67, %66 : vector<16x1xf32>
      %cst_42 = arith.constant 0.000000e+00 : f32
      %69 = vector.broadcast %cst_42 : f32 to vector<16x1xf32>
      %70 = arith.cmpf ogt, %61, %69 : vector<16x1xf32>
      %cst_43 = arith.constant 0.000000e+00 : f32
      %71 = vector.broadcast %cst_43 : f32 to vector<16x1xf32>
      %72 = arith.select %70, %68, %71 : vector<16x1xi1>, vector<16x1xf32>
      %c0_44 = arith.constant 0 : index
      %c0_45 = arith.constant 0 : index
      %73 = vector.load %arg6[%c0_44, %c0_45] : memref<16x1xf32, #tpu.memory_space<vmem>>, vector<16x1xf32>
      tpu.vector_store %arg6[%c0_44, %c0_45], %72 {strides = array<i32>} : memref<16x1xf32, #tpu.memory_space<vmem>>, vector<16x1xf32>,
    } else {
    }
    return
  }
  func.func @transform_0(%arg0: i32, %arg1: i32) -> (i32, i32) {
    %c0_i32 = arith.constant 0 : i32
    %c0_i32_0 = arith.constant 0 : i32
    return %arg0, %c0_i32 : i32, i32
  }
  func.func @transform_1(%arg0: i32, %arg1: i32) -> (i32, i32) {
    %c0_i32 = arith.constant 0 : i32
    %c0_i32_0 = arith.constant 0 : i32
    return %arg0, %c0_i32 : i32, i32
  }
  func.func @transform_2(%arg0: i32, %arg1: i32) -> (i32, i32) {
    %c0_i32 = arith.constant 0 : i32
    %c0_i32_0 = arith.constant 0 : i32
    return %arg1, %c0_i32 : i32, i32
  }
  func.func @transform_3(%arg0: i32, %arg1: i32) -> (i32, i32) {
    %c0_i32 = arith.constant 0 : i32
    %c0_i32_0 = arith.constant 0 : i32
    return %c0_i32, %arg1 : i32, i32
  }
  func.func @transform_4(%arg0: i32, %arg1: i32) -> (i32, i32) {
    %c0_i32 = arith.constant 0 : i32
    %c0_i32_0 = arith.constant 0 : i32
    return %arg0, %c0_i32 : i32, i32
  }
}

</mosaic_0001>

<bundles_post_ra>
// kernel: tpu_custom_call.1
= control target key start
LH: loop header
LB: loop body
LE: loop exit
PB: predicated region body
PF: predicated region fallthrough
CT: control target
= control target key end

     0   :  { %vm37_vm0 = vcmask 261120   ;;  %v345_v11 = vmov 0   ;;  %v116_v24 = vlaneseq  ;;  %v346_v28 = vmov 0.0   ;;  %s506_s2 = inlined_call_operand.vmem [shape: f32[128,32], index: 2, kind: input, shape index: {}]   ;;  %s507_s3 = inlined_call_operand.vmem [shape: s32[1,128], index: 3, kind: input, shape index: {}]   ;;  %s508_s1 = inlined_call_operand.vmem [shape: s32[16,1], index: 1, kind: input, shape index: {}]   ;;  %s509_s0 = inlined_call_operand.vmem [shape: f32[16,32], index: 0, kind: input, shape index: {}]   ;;  %s510_s4 = inlined_call_operand.vmem [shape: f32[16,1], index: 4, kind: output, shape index: {}]  }
   0x1   :  { %v36_v0 = vld [vmem:[%s506_s2 + $0x78] sm:$0xff]  ;;  %v35_v1 = vld [vmem:[%s506_s2 + $0x70] sm:$0xff]  ;;  %v34_v2 = vld [vmem:[%s506_s2 + $0x68] sm:$0xff]  ;;  %325 = vset.pattern.permute.xlu1 %v345_v11  ;;  %326 = vset.pattern.permute.xlu2 %v345_v11  ;;  %vm145_vm4 = vcmask 7168   ;;  %v347_v30 = vmov -1e+30  }
   0x2   :  { %286 = vmatpush.xpose.msk.msra.mxu0 %vm37_vm0, %v36_v0  ;;  %306 = vmatpush.xpose.msk.msra.mxu1 %vm37_vm0, %v36_v0  ;;  %v33_v3 = vld [vmem:[%s506_s2 + $0x60] sm:$0xff]  ;;  %v32_v4 = vld [vmem:[%s506_s2 + $0x58] sm:$0xff]  ;;  %v31_v5 = vld [vmem:[%s506_s2 + $0x50] sm:$0xff]  ;;  %v117_v25 = vand.u32 127, %v116_v24  ;;  %146 = vst.msk [vmem:[#allocation2] sm:$0xff] %vm145_vm4, %v347_v30 }
   0x3   :  { %v30_v6 = vld [vmem:[%s506_s2 + $0x48] sm:$0xff]  ;;  %v29_v7 = vld [vmem:[%s506_s2 + $0x40] sm:$0xff]  ;;  %v28_v8 = vld [vmem:[%s506_s2 + $0x38] sm:$0xff]  ;;  %327 = vset.pattern.permute.xlu0 %v345_v11  ;;  %147 = vst.msk [vmem:[#allocation2 + $0x8] sm:$0xff] %vm145_vm4, %v347_v30 }
   0x4   :  { %v121_v9 = vld [vmem:[%s508_s1] sm:$0xff]  ;;  %v27_v10 = vld [vmem:[%s506_s2 + $0x30] sm:$0xff]  ;;  %v26_v12 = vld [vmem:[%s506_s2 + $0x28] sm:$0xff]  ;;  %vm120_vm1 = vcmp.lt.s32.totalorder %v117_v25, 16  ;;  %148 = vst.msk [vmem:[#allocation3] sm:$0xff] %vm145_vm4, %v346_v28 }
   0x5   :  { %125 = vperm.xlu1 %325, %v121_v9   ;;  %v122_v13 = vld [vmem:[%s508_s1 + $0x8] sm:$0xff]  ;;  %v25_v14 = vld [vmem:[%s506_s2 + $0x20] sm:$0xff]  ;;  %v24_v15 = vld [vmem:[%s506_s2 + $0x18] sm:$0xff]  ;;  %149 = vst.msk [vmem:[#allocation3 + $0x8] sm:$0xff] %vm145_vm4, %v346_v28 }
   0x6   :  { %287 = vmatpush.xpose.msk.msra.mxu0 %vm37_vm0, %v35_v1  ;;  %307 = vmatpush.xpose.msk.msra.mxu1 %vm37_vm0, %v35_v1  ;;  %v23_v16 = vld [vmem:[%s506_s2 + $0x10] sm:$0xff]  ;;  %v22_v17 = vld [vmem:[%s506_s2 + $0x8] sm:$0xff]  ;;  %v17_v18 = vld [vmem:[%s509_s0] sm:$0xff]  ;;  %150 = vst.msk [vmem:[#allocation4] sm:$0xff] %vm145_vm4, %v346_v28 }
   0x7   :  { %v18_v19 = vld [vmem:[%s509_s0 + $0x8] sm:$0xff]  ;;  %v21_v20 = vld [vmem:[%s506_s2] sm:$0xff]  ;;  %v19_v21 = vmul.f32 14.285714, %v17_v18  ;;  %151 = vst.msk [vmem:[#allocation4 + $0x8] sm:$0xff] %vm145_vm4, %v346_v28 }
   0x8   :  { %v20_v22 = vmul.f32 14.285714, %v18_v19  ;;  %v328_v26 = vld [vmem:[%s507_s3] ss:$0 sm:$0xff]  ;;  %152 = vst.msk [vmem:[#allocation5] sm:$0xff] %vm145_vm4, %v346_v28 }
   0x9   :  { %153 = vst.msk [vmem:[#allocation5 + $0x8] sm:$0xff] %vm145_vm4, %v346_v28  ;;  %v156_v38 = vld [vmem:[#allocation2] sm:$0xff] }
   0xa   :  { %288 = vmatpush.xpose.msk.msra.mxu0 %vm37_vm0, %v34_v2  ;;  %308 = vmatpush.xpose.msk.msra.mxu1 %vm37_vm0, %v34_v2  ;;  %v157_v42 = vld [vmem:[#allocation2 + $0x8] sm:$0xff] }
   0xb   :  { %v170_v1 = vld [vmem:[#allocation3] sm:$0xff] }
   0xc   :  { %v171_v9 = vld [vmem:[#allocation3 + $0x8] sm:$0xff] }
   0xd   :  { %128 = vperm.xlu1 %325, %v122_v13  }
   0xe   :  { %289 = vmatpush.xpose.msk.msra.mxu0 %vm37_vm0, %v33_v3  ;;  %309 = vmatpush.xpose.msk.msra.mxu1 %vm37_vm0, %v33_v3 }
   0xf   :  { %v213_v51 = vld [vmem:[#allocation5] sm:$0xff] }
  0x10   :  { %v214_v49 = vld [vmem:[#allocation5 + $0x8] sm:$0xff] }
  0x12   :  { %290 = vmatpush.xpose.msk.msra.mxu0 %vm37_vm0, %v32_v4  ;;  %310 = vmatpush.xpose.msk.msra.mxu1 %vm37_vm0, %v32_v4 }
  0x16   :  { %291 = vmatpush.xpose.msk.msra.mxu0 %vm37_vm0, %v31_v5  ;;  %311 = vmatpush.xpose.msk.msra.mxu1 %vm37_vm0, %v31_v5 }
  0x1a   :  { %292 = vmatpush.xpose.msk.msra.mxu0 %vm37_vm0, %v30_v6  ;;  %312 = vmatpush.xpose.msk.msra.mxu1 %vm37_vm0, %v30_v6 }
  0x1e   :  { %293 = vmatpush.xpose.msk.msra.mxu0 %vm37_vm0, %v29_v7  ;;  %313 = vmatpush.xpose.msk.msra.mxu1 %vm37_vm0, %v29_v7 }
  0x22   :  { %294 = vmatpush.xpose.msk.msra.mxu0 %vm37_vm0, %v28_v8  ;;  %314 = vmatpush.xpose.msk.msra.mxu1 %vm37_vm0, %v28_v8 }
  0x26   :  { %295 = vmatpush.xpose.msk.msra.mxu0 %vm37_vm0, %v27_v10  ;;  %315 = vmatpush.xpose.msk.msra.mxu1 %vm37_vm0, %v27_v10 }
  0x2a   :  { %296 = vmatpush.xpose.msk.msra.mxu0 %vm37_vm0, %v26_v12  ;;  %316 = vmatpush.xpose.msk.msra.mxu1 %vm37_vm0, %v26_v12 }
  0x2e   :  { %297 = vmatpush.xpose.msk.msra.mxu0 %vm37_vm0, %v25_v14  ;;  %317 = vmatpush.xpose.msk.msra.mxu1 %vm37_vm0, %v25_v14 }
  0x32   :  { %298 = vmatpush.xpose.msk.msra.mxu0 %vm37_vm0, %v24_v15  ;;  %318 = vmatpush.xpose.msk.msra.mxu1 %vm37_vm0, %v24_v15 }
  0x36   :  { %299 = vmatpush.xpose.msk.msra.mxu0 %vm37_vm0, %v23_v16  ;;  %319 = vmatpush.xpose.msk.msra.mxu1 %vm37_vm0, %v23_v16 }
  0x3a   :  { %300 = vmatpush.xpose.msk.msra.mxu0 %vm37_vm0, %v22_v17  ;;  %320 = vmatpush.xpose.msk.msra.mxu1 %vm37_vm0, %v22_v17  ;;  %v201_v17 = vld [vmem:[#allocation4] sm:$0xff] }
  0x3e   :  { %301 = vmatpush.xpose.msk.msra.mxu0 %vm37_vm0, %v21_v20  ;;  %321 = vmatpush.xpose.msk.msra.mxu1 %vm37_vm0, %v21_v20 }
  0x41   :  { %302 = vmatmul.msk.f32.vlgmr.msra.gmra.mxu0 %vm37_vm0, %v19_v21  ;;  %303 = vmatmul.msk.f32.vlgmr.msra.gmra.mxu1 %vm37_vm0, %v20_v22 }
  0x77   :  { %v126_v23 = vpop.permute.xlu1 %125 }
  0x78   :  { %vm131_vm5 = vcmp.eq.s32.totalorder %v126_v23, %v328_v26 }
  0x79   :  { %vm135_vm6 = vmand %vm131_vm5, %vm120_vm1 }
  0x7a   :  { %v304_v31 = vsel %vm135_vm6, 1.0, %v346_v28 }
  0x7f   :  { %v129_v27 = vpop.permute.xlu1 %128 }
  0x80   :  { %vm132_vm2 = vcmp.eq.s32.totalorder %v129_v27, %v328_v26 }
  0x81   :  { %vm136_vm3 = vmand %vm132_vm2, %vm120_vm1 }
  0x82   :  { %v305_v29 = vsel %vm136_vm3, 1.0, %v346_v28 }
  0x83   :  { %217 = vadd.xlane.f32.xlu1 %v305_v29 }
  0xbe   :  { %v109_v32 = vpop.f32.mrf.mxu0  ;;  %v112_v33 = vpop.f32.mrf.mxu1 }
  0xbf   :  { %v203_v34 = vmul.f32 %v304_v31, %v109_v32  ;;  %v154_v35 = vsel %vm120_vm1, %v109_v32, -1e+30  ;;  %v204_v36 = vmul.f32 %v305_v29, %v112_v33  ;;  %v155_v37 = vsel %vm120_vm1, %v112_v33, -1e+30  ;;  %v202_v29 = vld [vmem:[#allocation4 + $0x8] sm:$0xff] }
  0xc0   :  { %158 = vmax.xlane.f32.xlu0 %v154_v35 }
  0xc8   :  { %160 = vmax.xlane.f32.xlu0 %v155_v37 }
  0xd0   :  { %215 = vadd.xlane.f32.xlu0 %v304_v31 }
  0xf6   :  { %v218_v50 = vpop.xlane.xlu1 %217 }
  0xf7   :  { %v220_v53 = vadd.f32 %v218_v50, %v214_v49 }
  0xf9   :  { %222 = vst.msk [vmem:[#allocation5 + $0x8] sm:$0xff] %vm145_vm4, %v220_v53 }
 0x100   :  { %v489_v2 = vld [vmem:[#allocation5 + $0x8] sm:$0xff] }
 0x101   :  { %v241_v6 = vmax.f32 %v489_v2, 1.0  ;;  %vm277_vm0 = vcmp.gt.f32.partialorder %v489_v2, 0.0 }
 0x103   :  { %vm262_vm11 = vweird.f32 %v241_v6 }
 0x133   :  { %v159_v39 = vpop.xlane.xlu0 %158 }
 0x134   :  { %v162_v40 = vmax.f32 %v156_v38, %v159_v39 }
 0x136   :  { %v164_v41 = vsub.f32 %v156_v38, %v162_v40  ;;  %199 = vst.msk [vmem:[#allocation2] sm:$0xff] %vm145_vm4, %v162_v40  ;;  %176 = vperm.xlu2 %326, %v162_v40   ;;  %v268_v38 = vand.u32 2147483648, %v241_v6 }
 0x138   :  { %v166_v60 = vmul.f32 1.442695, %v164_v41 }
 0x13b   :  { %v161_v43 = vpop.xlane.xlu0 %160 }
 0x13c   :  { %v163_v44 = vmax.f32 %v157_v42, %v161_v43 }
 0x13e   :  { %v165_v45 = vsub.f32 %v157_v42, %v163_v44  ;;  %200 = vst.msk [vmem:[#allocation2 + $0x8] sm:$0xff] %vm145_vm4, %v163_v44  ;;  %181 = vperm.xlu2 %326, %v163_v44   ;;  %v266_v42 = vand.u32 2147483647, %v241_v6 }
 0x140   :  { %v168_v62 = vmul.f32 1.442695, %v165_v45  ;;  %v269_v45 = vor.u32 1.1754944e-38, %v268_v38  ;;  %vm267_vm14 = vcmp.eq.f32.partialorder %v266_v42, 8.507059e+37 }
 0x143   :  { %v216_v52 = vpop.xlane.xlu0 %215 }
 0x144   :  { %v219_v54 = vadd.f32 %v216_v52, %v213_v51 }
 0x145   :  { %v227_v50 = vld [vmem:[#allocation2 + $0x8] sm:$0xff] }
 0x146   :  { %221 = vst.msk [vmem:[#allocation5] sm:$0xff] %vm145_vm4, %v219_v54 }
 0x14d   :  { %v486_v61 = vld [vmem:[#allocation5] sm:$0xff] }
 0x14e   :  { %v240_v63 = vmax.f32 %v486_v61, 1.0  ;;  %vm276_vm15 = vcmp.gt.f32.partialorder %v486_v61, 0.0 }
 0x150   :  { %vm247_vm7 = vweird.f32 %v240_v63  ;;  %v253_v22 = vand.u32 2147483648, %v240_v63  ;;  %v251_v25 = vand.u32 2147483647, %v240_v63 }
 0x152   :  { %v254_v28 = vor.u32 1.1754944e-38, %v253_v22  ;;  %vm252_vm10 = vcmp.eq.f32.partialorder %v251_v25, 8.507059e+37 }
 0x190   :  { %v177_v46 = vpop.permute.xlu2 %176 }
 0x191   :  { %v184_v47 = vsub.f32 %v154_v35, %v177_v46  ;;  %v226_v35 = vld [vmem:[#allocation2] sm:$0xff] }
 0x193   :  { %v186_v48 = vmul.f32 1.442695, %v184_v47 }
 0x195   :  { %329 = vpow2.f32 %v186_v48 }
 0x198   :  { %v182_v55 = vpop.permute.xlu2 %181 }
 0x199   :  { %v185_v56 = vsub.f32 %v155_v37, %v182_v55 }
 0x19b   :  { %v330_v57 = vpop.eup %329  ;;  %v188_v58 = vmul.f32 1.442695, %v185_v56 }
 0x19c   :  { %190 = vadd.xlane.f32.xlu2 %v330_v57 }
 0x19d   :  { %331 = vpow2.f32 %v188_v58 }
 0x19e   :  { %333 = vpow2.f32 %v166_v60 }
 0x19f   :  { %335 = vpow2.f32 %v168_v62 }
 0x1a0   :  { %337 = vrcp.f32 %v240_v63 }
 0x1a1   :  { %339 = vrcp.f32 %v241_v6 }
 0x1a3   :  { %v332_v59 = vpop.eup %331 }
 0x1a4   :  { %192 = vadd.xlane.f32.xlu0 %v332_v59  ;;  %v334_v0 = vpop.eup %333 }
 0x1a5   :  { %v172_v3 = vmul.f32 %v334_v0, %v170_v1  ;;  %v336_v7 = vpop.eup %335 }
 0x1a6   :  { %v338_v8 = vpop.eup %337  ;;  %v173_v10 = vmul.f32 %v336_v7, %v171_v9 }
 0x1a7   :  { %v243_v11 = vmul.f32 %v338_v8, %v240_v63  ;;  %v340_v16 = vpop.eup %339  ;;  %vm248_vm8 = vweird.f32 %v338_v8 }
 0x1a8   :  { %v258_v19 = vmul.f32 %v340_v16, %v241_v6  ;;  %vm249_vm9 = vmor %vm247_vm7, %vm248_vm8  ;;  %vm263_vm12 = vweird.f32 %v340_v16 }
 0x1a9   :  { %v244_v15 = vsub.f32 1.0, %v243_v11  ;;  %vm264_vm13 = vmor %vm262_vm11, %vm263_vm12 }
 0x1aa   :  { %v259_v26 = vsub.f32 1.0, %v258_v19 }
 0x1ab   :  { %v245_v18 = vmul.f32 %v338_v8, %v244_v15 }
 0x1ac   :  { %205 = vadd.xlane.f32.xlu0 %v203_v34  ;;  %v260_v32 = vmul.f32 %v340_v16, %v259_v26 }
 0x1ad   :  { %v246_v24 = vadd.f32 %v338_v8, %v245_v18 }
 0x1ae   :  { %v261_v41 = vadd.f32 %v340_v16, %v260_v32 }
 0x1af   :  { %v250_v31 = vsel %vm249_vm9, %v338_v8, %v246_v24 }
 0x1b0   :  { %v265_v48 = vsel %vm264_vm13, %v340_v16, %v261_v41 }
 0x1b1   :  { %v270_v51 = vsel %vm267_vm14, %v269_v45, %v265_v48 }
 0x1b4   :  { %207 = vadd.xlane.f32.xlu0 %v204_v36  ;;  %v255_v36 = vsel %vm252_vm10, %v254_v28, %v250_v31 }
 0x20f   :  { %v191_v4 = vpop.xlane.xlu2 %190 }
 0x210   :  { %v194_v5 = vadd.f32 %v191_v4, %v172_v3 }
 0x212   :  { %197 = vst.msk [vmem:[#allocation3] sm:$0xff] %vm145_vm4, %v194_v5 }
 0x217   :  { %v193_v12 = vpop.xlane.xlu0 %192 }
 0x218   :  { %v195_v13 = vadd.f32 %v193_v12, %v173_v10 }
 0x219   :  { %v228_v14 = vld [vmem:[#allocation3] sm:$0xff] }
 0x21a   :  { %198 = vst.msk [vmem:[#allocation3 + $0x8] sm:$0xff] %vm145_vm4, %v195_v13  ;;  %341 = vlog2.f32 %v228_v14 }
 0x21f   :  { %v206_v20 = vpop.xlane.xlu0 %205 }
 0x220   :  { %v209_v21 = vadd.f32 %v206_v20, %v201_v17  ;;  %v342_v27 = vpop.eup %341 }
 0x221   :  { %v229_v23 = vld [vmem:[#allocation3 + $0x8] sm:$0xff]  ;;  %v231_v30 = vmul.f32 0.6931472, %v342_v27 }
 0x222   :  { %211 = vst.msk [vmem:[#allocation4] sm:$0xff] %vm145_vm4, %v209_v21  ;;  %343 = vlog2.f32 %v229_v23 }
 0x223   :  { %v234_v39 = vadd.f32 %v231_v30, %v226_v35 }
 0x227   :  { %v208_v33 = vpop.xlane.xlu0 %207 }
 0x228   :  { %v210_v34 = vadd.f32 %v208_v33, %v202_v29  ;;  %v344_v43 = vpop.eup %343 }
 0x229   :  { %v238_v37 = vld [vmem:[#allocation4] sm:$0xff]  ;;  %v233_v46 = vmul.f32 0.6931472, %v344_v43 }
 0x22a   :  { %v256_v40 = vmul.f32 %v255_v36, %v238_v37  ;;  %212 = vst.msk [vmem:[#allocation4 + $0x8] sm:$0xff] %vm145_vm4, %v210_v34 }
 0x22b   :  { %v235_v53 = vadd.f32 %v233_v46, %v227_v50 }
 0x22c   :  { %v272_v44 = vsub.f32 %v256_v40, %v234_v39 }
 0x22e   :  { %v274_v47 = vmul.f32 -1.0, %v272_v44 }
 0x230   :  { %v278_v49 = vsel %vm276_vm15, %v274_v47, 0.0 }
 0x231   :  { %280 = vst.msk [vmem:[%s510_s4] sm:$0xff] %vm145_vm4, %v278_v49  ;;  %v239_v52 = vld [vmem:[#allocation4 + $0x8] sm:$0xff] }
 0x232   :  { %v271_v54 = vmul.f32 %v270_v51, %v239_v52 }
 0x234   :  { %v273_v55 = vsub.f32 %v271_v54, %v235_v53 }
 0x236   :  { %v275_v56 = vmul.f32 -1.0, %v273_v55 }
 0x238   :  { %v279_v57 = vsel %vm277_vm0, %v275_v56, 0.0 }
 0x239   :  { %281 = vst.msk [vmem:[%s510_s4 + $0x8] sm:$0xff] %vm145_vm4, %v279_v57 }

</bundles_post_ra>
